<compile_context>
chip_gen: v6e
topology: v6e:2x2x1
jax: 0.10.0
libtpu: 0.0.40
codegen_flags: <defaults>
</compile_context>

<pallas_src>
import jax
import jax.numpy as jnp
from jax import lax
from jax.experimental import pallas as pl
from jax.experimental.pallas import tpu as pltpu

DIM_LIST = [126, 32, 1]
_LANES = 128


def _round_up(x, m):
    return ((x + m - 1) // m) * m


def actor_kernel(x_ref, w1_ref, b1_ref, w2_ref, b2_ref, out_ref):
    # Layer 1: (tb, 128) @ (128, 32) on the MXU, f32 accumulate; bias + ReLU on VPU.
    h = jnp.dot(x_ref[...], w1_ref[...], preferred_element_type=jnp.float32)
    h = jnp.maximum(h + b1_ref[...], 0.0)                      # (tb, 32) f32
    # Layer 2: contract the 32-wide hidden dim with w2 (PyTorch (out=1, in=32) row):
    # (1, 32) . (tb, 32)^T -> (1, tb). Already lane-dense, so the store is a few
    # full-width vsts per tile instead of tb/8 masked (tb, 1) stores.
    y = lax.dot_general(
        w2_ref[...], h,
        dimension_numbers=(((1,), (1,)), ((), ())),
        preferred_element_type=jnp.float32,
    )
    out_ref[...] = (y + b2_ref[...]).astype(out_ref.dtype)


def actor_forward(x, w1, b1, w2, b2, *, tb=1024, compute_dtype=None):
    """Actor forward. x: (B, 126) -> (B,) float32.

    tb: batch tile (rows per grid step); rounded to a multiple of 128. Sweep
        {1024, 2048, 4096}; keep <= 8192 so double-buffered x tiles leave plenty
        of headroom in v7x's 64 MiB VMEM.
    compute_dtype: e.g. jnp.bfloat16 to halve the dominant HBM stream (x, W1);
        the matmul still accumulates in f32.
    """
    B, d_in = x.shape
    d_hidden = w1.shape[1]

    # Tiny batches: per-call / per-step overhead dwarfs ~8 KFLOP/row of work.
    if B < _LANES:
        h = jnp.maximum(x @ w1 + b1, 0.0)
        return (h @ w2.T + b2)[:, 0]

    d_pad = _round_up(d_in, _LANES)                                   # 126 -> 128
    tb_eff = max(_LANES, _round_up(min(tb, _round_up(B, _LANES)), _LANES))
    B_pad = _round_up(B, tb_eff)
    num_tiles = B_pad // tb_eff

    x_p = x
    if (B_pad != B) or (d_pad != d_in):
        x_p = jnp.pad(x, ((0, B_pad - B), (0, d_pad - d_in)))
    w1_p = jnp.pad(w1, ((0, d_pad - d_in), (0, 0))) if d_pad != d_in else w1
    if compute_dtype is not None:
        x_p = x_p.astype(compute_dtype)
        w1_p = w1_p.astype(compute_dtype)

    # Tell XLA this call is bandwidth-bound, not compute-bound.
    flops = 2 * B_pad * d_pad * d_hidden + 2 * B_pad * d_hidden
    bytes_accessed = (
        x_p.size * x_p.dtype.itemsize
        + w1_p.size * w1_p.dtype.itemsize
        + (b1.size + w2.size + b2.size) * 4
        + B_pad * 4
    )
    cost = pl.CostEstimate(flops=flops, transcendentals=0,
                           bytes_accessed=bytes_accessed)

    out_row = pl.pallas_call(
        actor_kernel,
        out_shape=jax.ShapeDtypeStruct((1, B_pad), jnp.float32),
        grid_spec=pltpu.PrefetchScalarGridSpec(
            num_scalar_prefetch=0,
            grid=(num_tiles,),
            in_specs=[
                pl.BlockSpec((tb_eff, d_pad), lambda i: (i, 0)),     # x tile over batch
                pl.BlockSpec((d_pad, d_hidden), lambda i: (0, 0)),   # W1 (resident)
                pl.BlockSpec((1, d_hidden), lambda i: (0, 0)),       # b1
                pl.BlockSpec((1, d_hidden), lambda i: (0, 0)),       # w2 row
                pl.BlockSpec((1, 1), lambda i: (0, 0)),              # b2
            ],
            out_specs=pl.BlockSpec((1, tb_eff), lambda i: (0, i)),   # lane-dense row
        ),
        compiler_params=pltpu.CompilerParams(
            dimension_semantics=("parallel",),   # pipelining + v7x megacore sharding
            vmem_limit_bytes=32 * 1024 * 1024,
        ),
        cost_estimate=cost,
    )(x_p, w1_p, b1, w2, b2)

    # torch.squeeze(x, dim=-1): (B, 1) -> (B,)  (here: drop padded rows, flatten row).
    return out_row[0, :B]


def init_actor_params(key, dim_list=DIM_LIST):
    """nn.Linear-style init (uniform +/- 1/sqrt(fan_in)) in the kernel's layout."""
    d0, d1, d2 = dim_list
    k1w, k1b, k2w, k2b = jax.random.split(key, 4)
    bnd1 = 1.0 / (d0 ** 0.5)
    bnd2 = 1.0 / (d1 ** 0.5)
    w1 = jax.random.uniform(k1w, (d0, d1), jnp.float32, -bnd1, bnd1)   # fc1.weight.T
    b1 = jax.random.uniform(k1b, (1, d1), jnp.float32, -bnd1, bnd1)
    w2 = jax.random.uniform(k2w, (d2, d1), jnp.float32, -bnd2, bnd2)   # fc2.weight (1, 32)
    b2 = jax.random.uniform(k2b, (d2, 1), jnp.float32, -bnd2, bnd2)    # (1, 1)
    return (w1, b1), (w2, b2)


def reference_forward(x, params):
    (w1, b1), (w2, b2) = params
    h = jnp.maximum(x @ w1 + b1, 0.0)
    return (h @ w2.T + b2)[:, 0]


if __name__ == "__main__":
    key = jax.random.PRNGKey(0)
    kx, kp = jax.random.split(key)

    (w1, b1), (w2, b2) = init_actor_params(kp)

    # Main check: batch tiled into 4 grid steps (tb=128) -> exercises pipelining.
    B = 512
    x = jax.random.normal(kx, (B, DIM_LIST[0]), dtype=jnp.float32)
    out = actor_forward(x, w1, b1, w2, b2, tb=128)
    out = jax.block_until_ready(out)
    ref = reference_forward(x, [(w1, b1), (w2, b2)])
    assert out.shape == (B,)
    assert jnp.allclose(out, ref, atol=1e-4, rtol=1e-4)

    # Ragged batch (not a multiple of the tile): padded rows are computed and dropped.
    B2 = 500
    x2 = x[:B2]
    out2 = jax.block_until_ready(actor_forward(x2, w1, b1, w2, b2, tb=128))
    ref2 = reference_forward(x2, [(w1, b1), (w2, b2)])
    assert out2.shape == (B2,)
    assert jnp.allclose(out2, ref2, atol=1e-4, rtol=1e-4)

    print("KERNEL_OK")
</pallas_src>

<mosaic_0001>
module attributes {stable_mosaic.version = 11 : i64} {
  func.func @actor_kernel(%arg0: i32, %arg1: memref<128x128xf32, #tpu.memory_space<vmem>>, %arg2: memref<128x32xf32, #tpu.memory_space<vmem>>, %arg3: memref<1x32xf32, #tpu.memory_space<vmem>>, %arg4: memref<1x32xf32, #tpu.memory_space<vmem>>, %arg5: memref<1x1xf32, #tpu.memory_space<vmem>>, %arg6: memref<1x128xf32, #tpu.memory_space<vmem>>) attributes {dimension_semantics = [#tpu.dimension_semantics<parallel>], iteration_bounds = array<i64: 4>, scalar_prefetch = 0 : i64, scratch_operands = 0 : i64, tpu.core_type = #tpu.core_type<tc>, window_params = [{transform_indices = @transform_0, window_bounds = array<i64: 128, 128>}, {pipeline_mode = #tpu.pipeline_mode<synchronous>, transform_indices = @transform_1, window_bounds = array<i64: 128, 32>}, {pipeline_mode = #tpu.pipeline_mode<synchronous>, transform_indices = @transform_2, window_bounds = array<i64: 1, 32>}, {pipeline_mode = #tpu.pipeline_mode<synchronous>, transform_indices = @transform_3, window_bounds = array<i64: 1, 32>}, {pipeline_mode = #tpu.pipeline_mode<synchronous>, transform_indices = @transform_4, window_bounds = array<i64: 1, 1>}, {transform_indices = @transform_5, window_bounds = array<i64: 1, 128>}]} {
    %c0 = arith.constant 0 : index
    %c0_0 = arith.constant 0 : index
    %0 = vector.load %arg1[%c0, %c0_0] : memref<128x128xf32, #tpu.memory_space<vmem>>, vector<128x128xf32>
    %c0_1 = arith.constant 0 : index
    %c0_2 = arith.constant 0 : index
    %1 = vector.load %arg2[%c0_1, %c0_2] : memref<128x32xf32, #tpu.memory_space<vmem>>, vector<128x32xf32>
    %cst = arith.constant dense<0.000000e+00> : vector<128x32xf32>
    %2 = tpu.matmul %0, %1, %cst {dimension_numbers = #tpu.dot_dimension_numbers<[1], [0], [0], [1], [0, 0, 1, 1], [], []>} : vector<128x128xf32>, vector<128x32xf32>, vector<128x32xf32> -> vector<128x32xf32>
    %c0_3 = arith.constant 0 : index
    %c0_4 = arith.constant 0 : index
    %3 = vector.load %arg3[%c0_3, %c0_4] : memref<1x32xf32, #tpu.memory_space<vmem>>, vector<1x32xf32>
    %4 = vector.broadcast %3 : vector<1x32xf32> to vector<128x32xf32>
    %5 = arith.addf %2, %4 : vector<128x32xf32>
    %cst_5 = arith.constant 0.000000e+00 : f32
    %6 = vector.broadcast %cst_5 : f32 to vector<128x32xf32>
    %7 = arith.maximumf %5, %6 : vector<128x32xf32>
    %c0_6 = arith.constant 0 : index
    %c0_7 = arith.constant 0 : index
    %8 = vector.load %arg4[%c0_6, %c0_7] : memref<1x32xf32, #tpu.memory_space<vmem>>, vector<1x32xf32>
    %cst_8 = arith.constant dense<0.000000e+00> : vector<1x128xf32>
    %9 = tpu.matmul %8, %7, %cst_8 {dimension_numbers = #tpu.dot_dimension_numbers<[1], [1], [0], [0], [0, 0, 1, 0], [], []>} : vector<1x32xf32>, vector<128x32xf32>, vector<1x128xf32> -> vector<1x128xf32>
    %c0_9 = arith.constant 0 : index
    %c0_10 = arith.constant 0 : index
    %10 = vector.load %arg5[%c0_9, %c0_10] : memref<1x1xf32, #tpu.memory_space<vmem>>, vector<1x1xf32>
    %11 = vector.broadcast %10 : vector<1x1xf32> to vector<1x128xf32>
    %12 = arith.addf %9, %11 : vector<1x128xf32>
    %c0_11 = arith.constant 0 : index
    %c0_12 = arith.constant 0 : index
    %13 = vector.load %arg6[%c0_11, %c0_12] : memref<1x128xf32, #tpu.memory_space<vmem>>, vector<1x128xf32>
    tpu.vector_store %arg6[%c0_11, %c0_12], %12 {strides = array<i32>} : memref<1x128xf32, #tpu.memory_space<vmem>>, vector<1x128xf32>,
    return
  }
  func.func @transform_0(%arg0: i32) -> (i32, i32) {
    %c0_i32 = arith.constant 0 : i32
    %c0_i32_0 = arith.constant 0 : i32
    return %arg0, %c0_i32 : i32, i32
  }
  func.func @transform_1(%arg0: i32) -> (i32, i32) {
    %c0_i32 = arith.constant 0 : i32
    %c0_i32_0 = arith.constant 0 : i32
    %c0_i32_1 = arith.constant 0 : i32
    return %c0_i32, %c0_i32_0 : i32, i32
  }
  func.func @transform_2(%arg0: i32) -> (i32, i32) {
    %c0_i32 = arith.constant 0 : i32
    %c0_i32_0 = arith.constant 0 : i32
    %c0_i32_1 = arith.constant 0 : i32
    return %c0_i32, %c0_i32_0 : i32, i32
  }
  func.func @transform_3(%arg0: i32) -> (i32, i32) {
    %c0_i32 = arith.constant 0 : i32
    %c0_i32_0 = arith.constant 0 : i32
    %c0_i32_1 = arith.constant 0 : i32
    return %c0_i32, %c0_i32_0 : i32, i32
  }
  func.func @transform_4(%arg0: i32) -> (i32, i32) {
    %c0_i32 = arith.constant 0 : i32
    %c0_i32_0 = arith.constant 0 : i32
    %c0_i32_1 = arith.constant 0 : i32
    return %c0_i32, %c0_i32_0 : i32, i32
  }
  func.func @transform_5(%arg0: i32) -> (i32, i32) {
    %c0_i32 = arith.constant 0 : i32
    %c0_i32_0 = arith.constant 0 : i32
    return %c0_i32, %arg0 : i32, i32
  }
}

</mosaic_0001>

<bundles_post_ra>
// kernel: tpu_custom_call.1
= control target key start
LH: loop header
LB: loop body
LE: loop exit
PB: predicated region body
PF: predicated region fallthrough
CT: control target
= control target key end

     0   :  { %s1274_s0 = inlined_call_operand.hbm [shape: f32[512,128], index: 0, kind: input, shape index: {}]   ;;  %s1275_s1 = inlined_call_operand.vmem [shape: f32[128,32], index: 1, kind: input, shape index: {}]   ;;  %s1276_s2 = inlined_call_operand.vmem [shape: f32[1,32], index: 2, kind: input, shape index: {}]   ;;  %s1277_s3 = inlined_call_operand.vmem [shape: f32[1,32], index: 3, kind: input, shape index: {}]   ;;  %s1278_s4 = inlined_call_operand.<no memory space> [shape: f32[1,1], index: 4, kind: input, shape index: {}]   ;;  %s1279_s5 = inlined_call_operand.hbm [shape: f32[1,512], index: 5, kind: output, shape index: {}]  }
   0x1   :  { %v10_v0 = vstv %s1278_s4 }
   0x2   :  { %11 = vst [vmem:[#allocation2] sm:$0x1] %v10_v0 }
   0x3   :  { %12 = vsyncpa [#allocation4], 0 }
   0x4   :  { %14 = vsyncpa [#allocation4 + $0x1], 0 }
   0x5   :  { %15 = vsyncpa [#allocation5], 0 }
   0x6   :  { %17 = vsyncpa [#allocation5 + $0x1], 0  ;;  %s1014_s20 = smov 0   ;;  %s1016_s21 = smov 0  }
   0x7   :  { %s1018_s22 = smov 0   ;;  %s1020_s23 = smov 0  }
   0x8 LB: > { %s1035_s4 = sadd.s32 4294967295, %s972_s23   ;;  %s658_s24 = sadd.s32 4294967294, %s972_s23   ;;  %s972_s23 = sphi %s1020_s23, %s1293_s23   ;;  %s968_s22 = sphi %s1018_s22, %s1292_s22   ;;  %s964_s21 = sphi %s1016_s21, %s1291_s21   ;;  %s960_s20 = sphi %s1014_s20, %s1290_s20  }
   0x9   : > { %s1039_s25 = sadd.s32 1, %s972_s23   ;;  %s30_s26 = sadd.s32 1, %s968_s22 }
   0xa   : > { %s27_s27 = ssub.s32 %s972_s23, %s1039_s25  ;;  %p37_p0 = scmp.ne.s32.totalorder %s968_s22, %s964_s21 }
   0xb   : > { %p28_p1 = scmp.eq.s32.totalorder %s27_s27, 0  ;;  %p38_p2 = scmp.eq.s32.totalorder %s972_s23, 0 }
   0xc   : > { %p43_p3 = scmp.ne.s32.totalorder %s964_s21, %s960_s20  ;;  %p44_p4 = scmp.eq.s32.totalorder %s1035_s4, 0 }
   0xd   : > { %s1051_s28 = scalar_select %p28_p1, %s968_s22, %s30_s26  }
   0xe   : > { %p1053_p5 = por %p38_p2, %p37_p0  ;;  %p1057_p6 = por %p44_p4, %p43_p3 }
   0xf   : > { %p151_p7 = scmp.eq.s32.totalorder %s1035_s4, 3  ;;  %p157_p8 = scmp.eq.s32.totalorder %s658_s24, 3 }
  0x10   : > { %s1283_s30 = scalar_select %p1057_p6, 1, 0 }
  0x11   : > { %p840_p9 = scmp.lt.s32.totalorder %s972_s23, 4  ;;  %p1063_p10 = por %p151_p7, %p37_p0 }
  0x12   : > { %p1067_p11 = por %p157_p8, %p43_p3  ;;  %s189_s8 = sand.u32 1, %s968_s22  }
  0x13   : > { %s1284_s6 = scalar_select %p1063_p10, 1, 0 }
  0x14   : > { %s1285_s7 = scalar_select %p1067_p11, 1, 0 }
  0x15   : > { %s687_s9 = sshll.u32 %s972_s23, 11  ;;  %s661_s10 = sshll.u32 %s189_s8, 7 }
  0x16   : > { %s1076_s13 = scalar_lea.hbm %s1274_s0, %s687_s9  ;;  %s193_s14 = scalar_lea.vmem [#allocation3], %s661_s10 }
  0x17   : > { %s200_s15 = sshll.u32 %s193_s14, 4  ;;  %p1080_p12 = pnand %p840_p9, %p1053_p5  ;;  %s1084_s15 = int_to_ptr.vmem [resolvable:$true] %s200_s15 }
  0x18   : > { %s1086_s17 = scalar_lea.sflag [#allocation4], %s189_s8  ;;  %s880_s18 = scalar_lea.hbm %s1076_s13, 2048 }
  0x19   : > { %p881_p13 = scmp.ne.s32.totalorder %s1076_s13, %s880_s18  ;;  %p882_p0 = pneg %p1080_p12 }
  0x1a   : > { %s885_s26 = scalar_lea.hbm %s1274_s0, 8192  ;;  %p886_p3 = scmp.lt.s32.totalorder %s1076_s13, %s1274_s0 }
  0x1b   : > { %p883_p1 = pnand %p882_p0, %p881_p13  ;;  %p887_p4 = scmp.lt.s32.totalorder %s885_s26, %s880_s18 }
  0x1d   : > { %p884_p2 = pneg %p883_p1  ;;  %p888_p5 = por %p887_p4, %p886_p3 }
  0x1f   : > { %p889_p7 = pnand %p888_p5, %p884_p2 }
  0x21   : > { %892 = shalt.err (!%p889_p7)
}
  0x22   : > { %s893_s8 = scalar_lea.vmem %s1084_s15, 2048  ;;  %s974_s9 = smov [#allocation3]  }
  0x23   : > { %p894_p8 = scmp.ne.s32.totalorder %s1084_s15, %s893_s8  ;;  %s898_s10 = sshll.u32 %s974_s9, 4  ;;  %s899_s10 = int_to_ptr.vmem [resolvable:$false] %s898_s10 }
  0x24   : > { %s900_s11 = scalar_lea.vmem %s899_s10, 4096  ;;  %p901_p1 = scmp.lt.s32.totalorder %s1084_s15, %s899_s10 }
  0x25   : > { %p896_p9 = pnand %p894_p8, %p882_p0  ;;  %p902_p11 = scmp.lt.s32.totalorder %s900_s11, %s893_s8 }
  0x27   : > { %p897_p13 = pneg %p896_p9  ;;  %p903_p10 = por %p902_p11, %p901_p1 }
  0x29   : > { %p904_p6 = pnand %p903_p10, %p897_p13 }
  0x2b   : > { %907 = shalt.err (!%p904_p6)
}
  0x2c   : > { %s975_s12 = smov 128   ;;  %s976_s14 = smov 8  }
  0x2d   : > { %835 = dma.hbm_to_vmem [thread:$0]  (!%p1080_p12), %s1076_s13, 2048, %s1084_s15, %s1086_s17, %s975_s12, %s975_s12, %s976_s14  }
  0x2e   : > { %p664_p0 = scmp.ge.s32.totalorder %s972_s23, 1  ;;  %p208_p2 = scmp.lt.s32.totalorder %s972_s23, 5 }
  0x30   : > { %p209_p3 = pnand %p664_p0, %p208_p2 }
  0x31   : > { %s1110_s18 = sand.u32 (!%p209_p3), 1, %s964_s21   ;;  %p1287_p6 = scmp.ne.s32.totalorder (!%p209_p3), %s1283_s30, 0 }
  0x32   : > { %212 = sbr.rel (%p209_p3) target bundleno = 585 (0x249), region = 40  ;;  %s665_s19 = sshll.u32 (!%p209_p3), %s1110_s18, 7 }
  0x33   : > { %s215_s24 = scalar_lea.sflag (!%p209_p3), [#allocation4], %s1110_s18  ;;  %s1114_s26 = scalar_lea.vmem (!%p209_p3), [#allocation3], %s665_s19 }
  0x37   : > { %951 = dma.done.wait (%p1287_p6), %s215_s24, 2048  }
  0x38   : > { %953 = vsyncadd (%p1287_p6), %s215_s24, 4294965248  ;;  %v276_v1 = vld [vmem:[%s1275_s1 + $0x78] sm:$0xff]  ;;  %v275_v2 = vld [vmem:[%s1275_s1 + $0x70] sm:$0xff]  ;;  %v977_v33 = vmov 0.0   ;;  %vm978_vm0 = vmmov 0   ;;  %v979_v35 = vmov 0  }
  0x39   : > { %737 = vmatprep.subr.mxu0 %v276_v1  ;;  %v274_v3 = vld [vmem:[%s1275_s1 + $0x68] sm:$0xff]  ;;  %v273_v4 = vld [vmem:[%s1275_s1 + $0x60] sm:$0xff]  ;;  %v272_v6 = vld [vmem:[%s1275_s1 + $0x58] sm:$0xff]  ;;  %793 = vmatprep.subr.mxu1 %v977_v33  ;;  %vm456_vm1 = vcmask 261120   ;;  %s684_s29 = sshll.u32 %s1035_s4, 4  ;;  %s243_s8 = scalar_lea.vmem [#allocation6], %s1110_s18 }
  0x3a   : > { %738 = vmatpush3.msra.mxu0 %v276_v1  ;;  %v245_v5 = vld [vmem:[%s1114_s26] sm:$0xff]  ;;  %v271_v7 = vld [vmem:[%s1275_s1 + $0x50] sm:$0xff]  ;;  %v268_v10 = vld [vmem:[%s1275_s1 + $0x38] sm:$0xff]  ;;  %825 = vmatprep.mubr.msk.f32.mxu1 %vm978_vm0, %v977_v33  ;;  %s592_s30 = sshll.u32 %s243_s8, 4  ;;  %s1238_s11 = scalar_lea.hbm %s1279_s5, %s684_s29  ;;  %s593_s30 = int_to_ptr.vmem [resolvable:$true] %s592_s30 }
  0x3b   : > { %739 = vmatprep.subr.mxu0 %v275_v2  ;;  %769 = vmatprep.mubr.f32.mxu0 %v245_v5  ;;  %v270_v8 = vld [vmem:[%s1275_s1 + $0x48] sm:$0xff]  ;;  %v269_v9 = vld [vmem:[%s1275_s1 + $0x40] sm:$0xff]  ;;  %v267_v11 = vld [vmem:[%s1275_s1 + $0x30] sm:$0xff]  ;;  %s580_s12 = scalar_lea.sflag [#allocation5], %s1110_s18  ;;  %s908_s14 = scalar_lea.vmem %s593_s30, 16 }
  0x3c   : > { %740 = vmatpush3.msra.mxu0 %v275_v2  ;;  %v266_v12 = vld [vmem:[%s1275_s1 + $0x28] sm:$0xff]  ;;  %v265_v13 = vld [vmem:[%s1275_s1 + $0x20] sm:$0xff]  ;;  %v264_v14 = vld [vmem:[%s1275_s1 + $0x18] sm:$0xff]  ;;  %879 = vset.pattern.permute.xlu0 %v979_v35  ;;  %p909_p10 = scmp.ne.s32.totalorder %s593_s30, %s908_s14  ;;  %p1288_p11 = scmp.ne.s32.totalorder %s1284_s6, 0 }
  0x3d   : > { %741 = vmatprep.subr.mxu0 %v274_v3  ;;  %v263_v15 = vld [vmem:[%s1275_s1 + $0x10] sm:$0xff]  ;;  %v262_v16 = vld [vmem:[%s1275_s1 + $0x8] sm:$0xff]  ;;  %v261_v17 = vld [vmem:[%s1275_s1] sm:$0xff]  ;;  %s980_s19 = smov [#allocation6]  }
  0x3e   : > { %742 = vmatpush3.msra.mxu0 %v274_v3  ;;  %v246_v18 = vld [vmem:[%s1114_s26 + $0x8] sm:$0xff]  ;;  %v247_v19 = vld [vmem:[%s1114_s26 + $0x10] sm:$0xff]  ;;  %v248_v20 = vld [vmem:[%s1114_s26 + $0x18] sm:$0xff]  ;;  %p910_p12 = pnand %p909_p10, %p1288_p11  ;;  %s912_s4 = sshll.u32 %s980_s19, 4  ;;  %s913_s4 = int_to_ptr.vmem [resolvable:$false] %s912_s4 }
  0x3f   : > { %743 = vmatprep.subr.mxu0 %v273_v4  ;;  %v249_v21 = vld [vmem:[%s1114_s26 + $0x20] sm:$0xff]  ;;  %v250_v22 = vld [vmem:[%s1114_s26 + $0x28] sm:$0xff]  ;;  %v251_v23 = vld [vmem:[%s1114_s26 + $0x30] sm:$0xff]  ;;  %s914_s24 = scalar_lea.vmem %s913_s4, 32  ;;  %p915_p5 = scmp.lt.s32.totalorder %s593_s30, %s913_s4 }
  0x40   : > { %744 = vmatpush3.msra.mxu0 %v273_v4  ;;  %v252_v24 = vld [vmem:[%s1114_s26 + $0x38] sm:$0xff]  ;;  %v253_v25 = vld [vmem:[%s1114_s26 + $0x40] sm:$0xff]  ;;  %v254_v26 = vld [vmem:[%s1114_s26 + $0x48] sm:$0xff]  ;;  %p911_p4 = pneg %p910_p12  ;;  %p916_p7 = scmp.lt.s32.totalorder %s914_s24, %s908_s14 }
  0x41   : > { %745 = vmatprep.subr.mxu0 %v272_v6  ;;  %v255_v27 = vld [vmem:[%s1114_s26 + $0x50] sm:$0xff]  ;;  %v256_v28 = vld [vmem:[%s1114_s26 + $0x58] sm:$0xff]  ;;  %v257_v29 = vld [vmem:[%s1114_s26 + $0x60] sm:$0xff] }
  0x42   : > { %746 = vmatpush3.msra.mxu0 %v272_v6  ;;  %v258_v30 = vld [vmem:[%s1114_s26 + $0x68] sm:$0xff]  ;;  %v259_v31 = vld [vmem:[%s1114_s26 + $0x70] sm:$0xff]  ;;  %v260_v32 = vld [vmem:[%s1114_s26 + $0x78] sm:$0xff]  ;;  %p917_p8 = por %p916_p7, %p915_p5 }
  0x43   : > { %747 = vmatprep.subr.mxu0 %v271_v7  ;;  %v446_v34 = vld [vmem:[#allocation2] sm:$0x1] }
  0x44   : > { %748 = vmatpush3.msra.mxu0 %v271_v7  ;;  %449 = vperm.xlu0 %879, %v446_v34   ;;  %v666_v50 = vld [vmem:[%s1276_s2] ss:$0 sm:$0xff]  ;;  %p918_p9 = pnand %p917_p8, %p911_p4 }
  0x45   : > { %749 = vmatprep.subr.mxu0 %v270_v8 }
  0x46   : > { %750 = vmatpush3.msra.mxu0 %v270_v8 }
  0x47   : > { %751 = vmatprep.subr.mxu0 %v269_v9 }
  0x48   : > { %752 = vmatpush3.msra.mxu0 %v269_v9 }
  0x49   : > { %753 = vmatprep.subr.mxu0 %v268_v10 }
  0x4a   : > { %754 = vmatpush3.msra.mxu0 %v268_v10 }
  0x4b   : > { %755 = vmatprep.subr.mxu0 %v267_v11 }
  0x4c   : > { %756 = vmatpush3.msra.mxu0 %v267_v11 }
  0x4d   : > { %757 = vmatprep.subr.mxu0 %v266_v12 }
  0x4e   : > { %758 = vmatpush3.msra.mxu0 %v266_v12 }
  0x4f   : > { %759 = vmatprep.subr.mxu0 %v265_v13 }
  0x50   : > { %760 = vmatpush3.msra.mxu0 %v265_v13 }
  0x51   : > { %761 = vmatprep.subr.mxu0 %v264_v14 }
  0x52   : > { %762 = vmatpush3.msra.mxu0 %v264_v14 }
  0x53   : > { %763 = vmatprep.subr.mxu0 %v263_v15 }
  0x54   : > { %764 = vmatpush3.msra.mxu0 %v263_v15 }
  0x55   : > { %765 = vmatprep.subr.mxu0 %v262_v16 }
  0x56   : > { %766 = vmatpush3.msra.mxu0 %v262_v16 }
  0x57   : > { %767 = vmatprep.subr.mxu0 %v261_v17 }
  0x58   : > { %768 = vmatpush3.msra.mxu0 %v261_v17 }
  0x59   : > { %770 = vmatmul.mubr.f32.vlgmr.msra.gmra.mxu0 %v246_v18 }
  0x5a   : > { %772 = vmatprep.mubr.f32.mxu0 %v247_v19 }
  0x5d   : > { %773 = vmatmul.mubr.f32.gmra.mxu0 %v248_v20 }
  0x5e   : > { %775 = vmatprep.mubr.f32.mxu0 %v249_v21  ;;  %v445_v21 = vld [vmem:[%s1277_s3] sm:$0x1] }
  0x61   : > { %776 = vmatmul.mubr.f32.gmra.mxu0 %v250_v22  ;;  %v452_v22 = vlaneseq }
  0x62   : > { %778 = vmatprep.mubr.f32.mxu0 %v251_v23 }
  0x63   : > { %v453_v23 = vshrl.u32 %v452_v22, 7 }
  0x65   : > { %779 = vmatmul.mubr.f32.gmra.mxu0 %v252_v24  ;;  %v454_v24 = vsub.s32 0, %v453_v23 }
  0x66   : > { %781 = vmatprep.mubr.f32.mxu0 %v253_v25 }
  0x69   : > { %782 = vmatmul.mubr.f32.gmra.mxu0 %v254_v26 }
  0x6a   : > { %784 = vmatprep.mubr.f32.mxu0 %v255_v27 }
  0x6d   : > { %785 = vmatmul.mubr.f32.gmra.mxu0 %v256_v28 }
  0x6e   : > { %787 = vmatprep.mubr.f32.mxu0 %v257_v29 }
  0x71   : > { %788 = vmatmul.mubr.f32.gmra.mxu0 %v258_v30 }
  0x72   : > { %790 = vmatprep.mubr.f32.mxu0 %v259_v31 }
  0x75   : > { %791 = vmatmul.mubr.f32.gmra.mxu0 %v260_v32 }
  0xbf   : > { %v450_v25 = vpop.permute.xlu0 %449 }
  0xc0   : > { %v455_v26 = vrot.slane %v450_v25, %v454_v24 }
 0x119   : > { %v1186_v36 = vpop.f32.mrf.mxu0 }
 0x11a   : > { %v356_v16 = vadd.f32 %v1186_v36, %v666_v50 }
 0x11b   : > { %v1188_v37 = vpop.f32.mrf.mxu0 }
 0x11c   : > { %v430_v18 = vmax.f32 %v356_v16, 0.0  ;;  %v351_v19 = vadd.f32 %v666_v50, %v1188_v37 }
 0x11d   : > { %v774_v38 = vpop.f32.mrf.mxu0 }
 0x11e   : > { %v366_v12 = vadd.f32 %v774_v38, %v666_v50  ;;  %v429_v20 = vmax.f32 %v351_v19, 0.0 }
 0x11f   : > { %v1190_v39 = vpop.f32.mrf.mxu0 }
 0x120   : > { %v432_v14 = vmax.f32 %v366_v12, 0.0  ;;  %v361_v15 = vadd.f32 %v666_v50, %v1190_v39 }
 0x121   : > { %v777_v40 = vpop.f32.mrf.mxu0 }
 0x122   : > { %v376_v8 = vadd.f32 %v777_v40, %v666_v50  ;;  %v431_v17 = vmax.f32 %v361_v15, 0.0 }
 0x123   : > { %v370_v41 = vpop.f32.mrf.mxu0 }
 0x124   : > { %v434_v10 = vmax.f32 %v376_v8, 0.0  ;;  %v371_v11 = vadd.f32 %v666_v50, %v370_v41 }
 0x125   : > { %v780_v42 = vpop.f32.mrf.mxu0 }
 0x126   : > { %v386_v4 = vadd.f32 %v780_v42, %v666_v50  ;;  %v433_v13 = vmax.f32 %v371_v11, 0.0 }
 0x127   : > { %v380_v43 = vpop.f32.mrf.mxu0 }
 0x128   : > { %v436_v6 = vmax.f32 %v386_v4, 0.0  ;;  %v381_v7 = vadd.f32 %v666_v50, %v380_v43 }
 0x129   : > { %v783_v44 = vpop.f32.mrf.mxu0 }
 0x12a   : > { %v396_v0 = vadd.f32 %v783_v44, %v666_v50  ;;  %v435_v9 = vmax.f32 %v381_v7, 0.0 }
 0x12b   : > { %v390_v45 = vpop.f32.mrf.mxu0 }
 0x12c   : > { %v438_v2 = vmax.f32 %v396_v0, 0.0  ;;  %v391_v3 = vadd.f32 %v666_v50, %v390_v45 }
 0x12d   : > { %v786_v46 = vpop.f32.mrf.mxu0 }
 0x12e   : > { %v406_v60 = vadd.f32 %v786_v46, %v666_v50  ;;  %v437_v5 = vmax.f32 %v391_v3, 0.0 }
 0x12f   : > { %v400_v47 = vpop.f32.mrf.mxu0 }
 0x130   : > { %v440_v62 = vmax.f32 %v406_v60, 0.0  ;;  %v401_v63 = vadd.f32 %v666_v50, %v400_v47 }
 0x131   : > { %v789_v48 = vpop.f32.mrf.mxu0 }
 0x132   : > { %v416_v56 = vadd.f32 %v789_v48, %v666_v50  ;;  %v439_v1 = vmax.f32 %v401_v63, 0.0 }
 0x133   : > { %v410_v49 = vpop.f32.mrf.mxu0 }
 0x134   : > { %v442_v58 = vmax.f32 %v416_v56, 0.0  ;;  %v411_v59 = vadd.f32 %v666_v50, %v410_v49 }
 0x135   : > { %v792_v51 = vpop.f32.mrf.mxu0 }
 0x136   : > { %v426_v52 = vadd.f32 %v792_v51, %v666_v50  ;;  %v441_v61 = vmax.f32 %v411_v59, 0.0 }
 0x137   : > { %v420_v53 = vpop.f32.mrf.mxu0 }
 0x138   : > { %v444_v54 = vmax.f32 %v426_v52, 0.0  ;;  %v421_v55 = vadd.f32 %v666_v50, %v420_v53 }
 0x13a   : > { %794 = vmatpush3.xpose.msk.msra.mxu1 %vm456_vm1, %v444_v54  ;;  %v443_v57 = vmax.f32 %v421_v55, 0.0 }
 0x13b   : > { %795 = vmatprep.subr.mxu1 %v977_v33 }
 0x13e   : > { %796 = vmatpush3.xpose.msk.msra.mxu1 %vm456_vm1, %v443_v57 }
 0x13f   : > { %797 = vmatprep.subr.mxu1 %v977_v33 }
 0x142   : > { %798 = vmatpush3.xpose.msk.msra.mxu1 %vm456_vm1, %v442_v58 }
 0x143   : > { %799 = vmatprep.subr.mxu1 %v977_v33 }
 0x146   : > { %800 = vmatpush3.xpose.msk.msra.mxu1 %vm456_vm1, %v441_v61 }
 0x147   : > { %801 = vmatprep.subr.mxu1 %v977_v33 }
 0x14a   : > { %802 = vmatpush3.xpose.msk.msra.mxu1 %vm456_vm1, %v440_v62 }
 0x14b   : > { %803 = vmatprep.subr.mxu1 %v977_v33 }
 0x14e   : > { %804 = vmatpush3.xpose.msk.msra.mxu1 %vm456_vm1, %v439_v1 }
 0x14f   : > { %805 = vmatprep.subr.mxu1 %v977_v33 }
 0x152   : > { %806 = vmatpush3.xpose.msk.msra.mxu1 %vm456_vm1, %v438_v2 }
 0x153   : > { %807 = vmatprep.subr.mxu1 %v977_v33 }
 0x156   : > { %808 = vmatpush3.xpose.msk.msra.mxu1 %vm456_vm1, %v437_v5 }
 0x157   : > { %809 = vmatprep.subr.mxu1 %v977_v33 }
 0x15a   : > { %810 = vmatpush3.xpose.msk.msra.mxu1 %vm456_vm1, %v436_v6 }
 0x15b   : > { %811 = vmatprep.subr.mxu1 %v977_v33 }
 0x15e   : > { %812 = vmatpush3.xpose.msk.msra.mxu1 %vm456_vm1, %v435_v9 }
 0x15f   : > { %813 = vmatprep.subr.mxu1 %v977_v33 }
 0x162   : > { %814 = vmatpush3.xpose.msk.msra.mxu1 %vm456_vm1, %v434_v10 }
 0x163   : > { %815 = vmatprep.subr.mxu1 %v977_v33 }
 0x166   : > { %816 = vmatpush3.xpose.msk.msra.mxu1 %vm456_vm1, %v433_v13 }
 0x167   : > { %817 = vmatprep.subr.mxu1 %v977_v33 }
 0x16a   : > { %818 = vmatpush3.xpose.msk.msra.mxu1 %vm456_vm1, %v432_v14 }
 0x16b   : > { %819 = vmatprep.subr.mxu1 %v977_v33 }
 0x16e   : > { %820 = vmatpush3.xpose.msk.msra.mxu1 %vm456_vm1, %v431_v17 }
 0x16f   : > { %821 = vmatprep.subr.mxu1 %v977_v33 }
 0x172   : > { %822 = vmatpush3.xpose.msk.msra.mxu1 %vm456_vm1, %v430_v18 }
 0x173   : > { %823 = vmatprep.subr.mxu1 %v977_v33 }
 0x176   : > { %824 = vmatpush3.xpose.msk.msra.mxu1 %vm456_vm1, %v429_v20 }
 0x179   : > { %826 = vmatmul.mubr.msk.f32.vlgmr.msra.gmra.mxu1 %vm456_vm1, %v445_v21 }
 0x239   : > { %v574_v27 = vpop.f32.mrf.mxu1 }
 0x23a   : > { %v575_v28 = vadd.f32 %v574_v27, %v455_v26 }
 0x23b   : > { %v827_v29 = vpop.f32.mrf.mxu1 }
 0x23c   : > { %578 = vst [vmem:[%s243_s8] sm:$0x1] %v575_v28 }
 0x23d   : > { %921 = shalt.err (!%p918_p9)
}
 0x23e   : > { %s922_s13 = scalar_lea.hbm %s1238_s11, 16  ;;  %s926_s26 = scalar_lea.hbm %s1279_s5, 64 }
 0x23f   : > { %p923_p13 = scmp.ne.s32.totalorder %s1238_s11, %s922_s13  ;;  %p927_p2 = scmp.lt.s32.totalorder %s1238_s11, %s1279_s5 }
 0x240   : > { %p928_p3 = scmp.lt.s32.totalorder %s926_s26, %s922_s13 }
 0x241   : > { %p924_p1 = pnand %p923_p13, %p1288_p11 }
 0x242   : > { %p929_p6 = por %p928_p3, %p927_p2 }
 0x243   : > { %p925_p0 = pneg %p924_p1 }
 0x245   : > { %p930_p10 = pnand %p929_p6, %p925_p0 }
 0x247   : > { %933 = shalt.err (!%p930_p10)
}
 0x248   : > { %830 = dma.vmem_to_hbm [thread:$0]  (%p1288_p11), %s593_s30, 16, %s1238_s11, %s580_s12  }
 0x249 PF: > { %p841_p12 = scmp.ge.s32.totalorder %s972_s23, 2  ;;  %s604_s27 = sand.u32 1, %s960_s20  }
 0x24a   : > { %p1289_p4 = scmp.ne.s32.totalorder %s1285_s7, 0  ;;  %s605_s29 = scalar_lea.sflag [#allocation5], %s604_s27 }
 0x24c   : > { %p837_p5 = pnand %p841_p12, %p1289_p4 }
 0x24e   : > { %p838_p7 = pneg %p837_p5 }
 0x250   : > { %955 = dma.done.wait (%p838_p7), %s605_s29, 16  }
 0x251   : > { %957 = vsyncadd (%p838_p7), %s605_s29, 4294967280  ;;  %p20_p8 = scmp.ge.s32.totalorder %s1039_s25, 6   ;;  %s1290_s20 = smov %s964_s21 }
 0x252   : > { %s1291_s21 = smov %s968_s22  ;;  %s1292_s22 = smov %s1051_s28 }
 0x253   : > { %s1293_s23 = smov %s1039_s25  ;;  %22 = sbr.rel (!%p20_p8) target bundleno = 8 (0x8), region = 85 }
 0x258   :  { %609 = vsyncpa [#allocation4], 1 }
 0x259   :  { %611 = vsyncpa [#allocation4 + $0x1], 1 }
 0x25a   :  { %612 = vsyncpa [#allocation5], 1 }
 0x25b   :  { %614 = vsyncpa [#allocation5 + $0x1], 1 }

</bundles_post_ra>
